<compile_context>
chip_gen: v5e
topology: v5e:2x2
jax: 0.10.0
libtpu: 0.0.40
codegen_flags: <defaults>
</compile_context>

<pallas_src>
import jax
import jax.numpy as jnp
from jax.experimental import pallas as pl
from jax.experimental.pallas import tpu as pltpu


def _round_up(x, m):
    return ((x + m - 1) // m) * m


# -----------------------------------------------------------------------------
# Pallas kernel: fused T-step DCRNN rollout + ReLU + Linear head
# -----------------------------------------------------------------------------
def _dcrnn_rollout_kernel(x_ref, h0_ref, tf_ref, tb_ref, wx_ref, whzr_ref,
                          whh_ref, bzr_ref, bh_ref, wlin_ref, blin_ref,
                          y_ref, hT_ref, h_scr, y_scr):
    """One grid step == one timestep of the diffusion-conv GRU.

    x_ref   : [N, lags]        bf16, streamed per step
    h0_ref  : [N, F]           f32, initial hidden state (read at t==0)
    tf/tb   : [N, N]           bf16 dense diffusion transitions (resident)
    wx_ref  : [lags, 3G_zr+3G_h] bf16, x-part of all gates
                               column groups: [zr0 | zr_fwd | zr_bwd | h0 | h_fwd | h_bwd]
                               each zr group g_zr wide ([z|r|pad]), each h group g_h wide
    whzr_ref: [F, 3G_zr]       bf16, h-part of the z/r gates
    whh_ref : [F, 3G_h]        bf16, (h*r)-part of the candidate gate
    bzr_ref : [1, G_zr] f32,   bh_ref: [1, G_h] f32   gate bias rows
    wlin_ref: [F, 128]  bf16,  blin_ref: [1, 128] f32 linear head
    y_ref   : [N, T_pad] f32 output (lane t holds y[t]); hT_ref: [N, F] final state
    h_scr   : [N, F] f32 carry; y_scr: [N, T_pad] f32 accumulator
    """
    t = pl.program_id(0)
    f = hT_ref.shape[-1]
    g_zr = bzr_ref.shape[-1]
    g_h = bh_ref.shape[-1]
    bf16 = jnp.bfloat16
    f32 = jnp.float32

    @pl.when(t == 0)
    def _():
        h_scr[...] = h0_ref[...]
        y_scr[...] = jnp.zeros_like(y_scr)

    h = h_scr[...]                       # f32 carried state
    h_bf = h.astype(bf16)
    x = x_ref[...]                       # bf16 [N, lags]
    t_fwd = tf_ref[...]
    t_bwd = tb_ref[...]

    # X-contribution of all three gates in one MXU push.
    p_x = jnp.dot(x, wx_ref[...], preferred_element_type=f32)          # [N, 3G_zr+3G_h]

    # Update / reset gates: K=2 dual-direction diffusion applied post-matmul.
    p_zr = p_x[:, :3 * g_zr] + jnp.dot(h_bf, whzr_ref[...], preferred_element_type=f32)
    pre_zr = (p_zr[:, :g_zr]
              + jnp.dot(t_fwd, p_zr[:, g_zr:2 * g_zr].astype(bf16),
                        preferred_element_type=f32)
              + jnp.dot(t_bwd, p_zr[:, 2 * g_zr:3 * g_zr].astype(bf16),
                        preferred_element_type=f32)
              + bzr_ref[...])
    zr = jax.nn.sigmoid(pre_zr)          # f32; first 2F lanes are real
    z = zr[:, :f]
    r = zr[:, f:2 * f]

    # Candidate state: X part from p_x, H part uses H*R (blend in f32, matmul in bf16).
    hr_bf = (h * r).astype(bf16)
    p_h = p_x[:, 3 * g_zr:] + jnp.dot(hr_bf, whh_ref[...], preferred_element_type=f32)
    pre_h = (p_h[:, :g_h]
             + jnp.dot(t_fwd, p_h[:, g_h:2 * g_h].astype(bf16),
                       preferred_element_type=f32)
             + jnp.dot(t_bwd, p_h[:, 2 * g_h:3 * g_h].astype(bf16),
                       preferred_element_type=f32)
             + bh_ref[...])
    h_tilde = jnp.tanh(pre_h)[:, :f]

    h_new = z * h + (1.0 - z) * h_tilde  # f32 GRU blend
    h_scr[...] = h_new
    hT_ref[...] = h_new                  # resident output; HBM writeback once at the end

    # Linear head on relu(h_new); pack y[t] into lane t of the lane-dense y slab.
    y_full = jnp.dot(jnp.maximum(h_new, 0.0).astype(bf16), wlin_ref[...],
                     preferred_element_type=f32) + blin_ref[...]        # [N, 128]
    y_col = y_full[:, :1]                                               # [N, 1]
    lane = jax.lax.broadcasted_iota(jnp.int32, y_scr.shape, 1)
    y_scr[...] = jnp.where(lane == t, y_col, y_scr[...])

    @pl.when(t == pl.num_programs(0) - 1)
    def _():
        y_ref[...] = y_scr[...]


# -----------------------------------------------------------------------------
# Graph preprocessing (done ONCE per graph, outside the rollout)
# -----------------------------------------------------------------------------
def build_transitions(edge_index, edge_weight, num_nodes):
    """Dense DCRNN diffusion transitions: T_fwd = D_out^{-1} A, T_bwd = D_in^{-1} A^T."""
    # TODO(synk): torch_geometric_temporal's DConv normalizes per edge inside message
    # passing (with a known x_i/x_j quirk); this uses the paper-standard dense
    # random-walk transition matrices instead.
    src, dst = edge_index[0], edge_index[1]
    adj = jnp.zeros((num_nodes, num_nodes), jnp.float32).at[src, dst].add(edge_weight)
    deg_out = adj.sum(axis=1)
    deg_in = adj.sum(axis=0)
    inv_out = jnp.where(deg_out > 0, 1.0 / deg_out, 0.0)
    inv_in = jnp.where(deg_in > 0, 1.0 / deg_in, 0.0)
    return adj * inv_out[:, None], adj.T * inv_in[:, None]


# -----------------------------------------------------------------------------
# Wrapper: pallas_call over the time grid
# -----------------------------------------------------------------------------
def _vmem_budget_bytes(n, lags, f, t_pad, g_zr, g_h):
    bf, f4 = 2, 4
    est = (2 * n * lags * bf                      # streamed x block (double-buffered)
           + n * f * f4                           # h0
           + 2 * n * n * bf                       # transitions
           + lags * 3 * (g_zr + g_h) * bf         # w_x
           + f * 3 * (g_zr + g_h) * bf            # w_h_zr + w_hh
           + (g_zr + g_h + 2 * 128) * f4          # bias rows + blin
           + f * 128 * bf                         # w_lin
           + 2 * n * t_pad * f4                   # y out + y scratch
           + 2 * n * f * f4)                      # hT out + h scratch
    # generous headroom for (8,128) tile padding & compiler scratch; clamp to all gens
    return int(min(max(4 * est, 16 * 1024 * 1024), 60 * 1024 * 1024))


def dcrnn_recurrent_gcn(x_seq, t_fwd, t_bwd, h0, params):
    """Fused T-step DCRNN rollout.

    x_seq: [T, N, lags] f32; t_fwd/t_bwd: [N, N] f32 (precomputed once per graph);
    h0: [N, F] f32. Returns (y_seq [T, N, 1] f32, h_T [N, F] f32).
    The PyTorch module's forward() (DCRNN called with H=None) is the T=1 / h0=0 case.
    """
    T, n, lags = x_seq.shape
    f = h0.shape[-1]
    g_zr = params["b_zr"].shape[-1]
    g_h = params["b_h"].shape[-1]
    t_pad = _round_up(T, 128)

    x_bf = x_seq.astype(jnp.bfloat16)
    tf_bf = t_fwd.astype(jnp.bfloat16)
    tb_bf = t_bwd.astype(jnp.bfloat16)

    def resident(shape):                          # whole array, VMEM-resident across T
        nd = len(shape)
        return pl.BlockSpec(shape, lambda *_: (0,) * nd)

    in_specs = [
        pl.BlockSpec((pl.Squeezed(), n, lags), lambda t: (t, 0, 0)),   # x[t] streamed
        resident((n, f)),                                              # h0
        resident((n, n)), resident((n, n)),                            # t_fwd, t_bwd
        resident((lags, 3 * g_zr + 3 * g_h)),                          # w_x
        resident((f, 3 * g_zr)),                                       # w_h_zr
        resident((f, 3 * g_h)),                                        # w_hh
        resident((1, g_zr)), resident((1, g_h)),                       # gate bias rows
        resident((f, 128)), resident((1, 128)),                        # linear head
    ]
    out_specs = (resident((n, t_pad)), resident((n, f)))
    out_shape = (jax.ShapeDtypeStruct((n, t_pad), jnp.float32),
                 jax.ShapeDtypeStruct((n, f), jnp.float32))
    scratch = [pltpu.VMEM((n, f), jnp.float32),        # h carry
               pltpu.VMEM((n, t_pad), jnp.float32)]    # y accumulator

    y_pad, h_T = pl.pallas_call(
        _dcrnn_rollout_kernel,
        grid=(T,),
        in_specs=in_specs,
        out_specs=out_specs,
        out_shape=out_shape,
        scratch_shapes=scratch,
        compiler_params=pltpu.CompilerParams(
            dimension_semantics=("arbitrary",),        # sequential recurrence over T
            vmem_limit_bytes=_vmem_budget_bytes(n, lags, f, t_pad, g_zr, g_h)),
    )(x_bf, h0, tf_bf, tb_bf, params["w_x"], params["w_h_zr"], params["w_hh"],
      params["b_zr"], params["b_h"], params["w_lin"], params["b_lin"])

    y_seq = jnp.transpose(y_pad[:, :T])[..., None]     # [T, N, 1]
    return y_seq, h_T


# -----------------------------------------------------------------------------
# Parameters (torch layout) and packing into lane-aligned kernel slabs
# -----------------------------------------------------------------------------
def make_raw_params(key, lags, filters):
    """DCRNN(lags, filters, K=2) + Linear(filters, 1) parameters, torch layout."""
    ks = jax.random.split(key, 8)
    scale = 0.1

    def rnd(k, shape):
        return (scale * jax.random.normal(k, shape)).astype(jnp.float32)

    c_in = lags + filters
    w_z, w_r, w_h = (rnd(ks[i], (2, 2, c_in, filters)) for i in range(3))
    b_z, b_r, b_h = (rnd(ks[3 + i], (filters,)) for i in range(3))
    w_lin = rnd(ks[6], (filters, 1))
    b_lin = rnd(ks[7], (1, 1))
    return (w_z, b_z), (w_r, b_r), (w_h, b_h), w_lin, b_lin


def pack_params(raw_params, lags, filters):
    """Pack torch-layout DCRNN params into lane-aligned bf16 slabs for the kernel."""
    (w_z, b_z), (w_r, b_r), (w_h, b_h), w_lin, b_lin = raw_params
    f = filters
    g_zr = _round_up(2 * f, 128)
    g_h = _round_up(f, 128)

    def split(w):
        # torch concatenates [X, H] along features -> X rows first, then H rows.
        wx, wh = w[:, :, :lags, :], w[:, :, lags:, :]
        return ((wx[0, 0] + wx[1, 0], wx[0, 1], wx[1, 1]),
                (wh[0, 0] + wh[1, 0], wh[0, 1], wh[1, 1]))

    (zx0, zxf, zxb), (zh0, zhf, zhb) = split(w_z)
    (rx0, rxf, rxb), (rh0, rhf, rhb) = split(w_r)
    (hx0, hxf, hxb), (hh0, hhf, hhb) = split(w_h)

    def pad_cols(a, width):
        return jnp.pad(a, ((0, 0), (0, width - a.shape[1])))

    def zr_group(zb, rb):      # [rows, g_zr] = [z | r | zero-pad]
        return pad_cols(jnp.concatenate([zb, rb], axis=1), g_zr)

    def h_group(hb):           # [rows, g_h] = [h | zero-pad]
        return pad_cols(hb, g_h)

    w_x = jnp.concatenate(
        [zr_group(zx0, rx0), zr_group(zxf, rxf), zr_group(zxb, rxb),
         h_group(hx0), h_group(hxf), h_group(hxb)], axis=1)       # [lags, 3g_zr+3g_h]
    w_h_zr = jnp.concatenate(
        [zr_group(zh0, rh0), zr_group(zhf, rhf), zr_group(zhb, rhb)], axis=1)  # [F, 3g_zr]
    w_hh = jnp.concatenate(
        [h_group(hh0), h_group(hhf), h_group(hhb)], axis=1)       # [F, 3g_h]

    b_zr = pad_cols(jnp.concatenate([b_z, b_r])[None, :], g_zr)   # [1, g_zr]
    b_hc = pad_cols(b_h[None, :], g_h)                            # [1, g_h]
    w_lin_pad = pad_cols(w_lin, 128)                              # [F, 128]
    b_lin_pad = pad_cols(b_lin, 128)                              # [1, 128]

    bf16 = jnp.bfloat16
    return dict(w_x=w_x.astype(bf16), w_h_zr=w_h_zr.astype(bf16), w_hh=w_hh.astype(bf16),
                b_zr=b_zr.astype(jnp.float32), b_h=b_hc.astype(jnp.float32),
                w_lin=w_lin_pad.astype(bf16), b_lin=b_lin_pad.astype(jnp.float32))


# -----------------------------------------------------------------------------
# Pure-JAX f32 reference (module semantics, rolled out over T)
# -----------------------------------------------------------------------------
def _dconv_ref(c, t_fwd, t_bwd, w, b):
    out = c @ (w[0, 0] + w[1, 0]) + (t_fwd @ c) @ w[0, 1] + (t_bwd @ c) @ w[1, 1]
    return out + b


def _reference_rollout(x_seq, h0, t_fwd, t_bwd, raw_params):
    (w_z, b_z), (w_r, b_r), (w_h, b_h), w_lin, b_lin = raw_params
    h = h0
    ys = []
    for t in range(x_seq.shape[0]):
        x = x_seq[t]
        xh = jnp.concatenate([x, h], axis=1)
        z = jax.nn.sigmoid(_dconv_ref(xh, t_fwd, t_bwd, w_z, b_z))
        r = jax.nn.sigmoid(_dconv_ref(xh, t_fwd, t_bwd, w_r, b_r))
        xhr = jnp.concatenate([x, h * r], axis=1)
        h_tilde = jnp.tanh(_dconv_ref(xhr, t_fwd, t_bwd, w_h, b_h))
        h = z * h + (1.0 - z) * h_tilde
        ys.append(jnp.maximum(h, 0.0) @ w_lin + b_lin)
    return jnp.stack(ys), h


if __name__ == "__main__":
    key = jax.random.PRNGKey(0)
    k_x, k_h, k_w, k_ew = jax.random.split(key, 4)

    N_NODES = 16    # graph nodes
    LAGS = 4        # in_channels of DCRNN (= lags)
    FILTERS = 32    # out_channels of DCRNN
    T_STEPS = 8     # fused rollout length

    x_seq = jax.random.normal(k_x, (T_STEPS, N_NODES, LAGS), dtype=jnp.float32)
    h0_rand = 0.5 * jax.random.normal(k_h, (N_NODES, FILTERS), dtype=jnp.float32)
    h0_zero = jnp.zeros((N_NODES, FILTERS), jnp.float32)

    # Deterministic directed graph: every node has out/in degree 3 (no zero degrees).
    base = jnp.arange(N_NODES, dtype=jnp.int32)
    src = jnp.concatenate([base, base, base])
    dst = jnp.concatenate([(base + 1) % N_NODES, (base + 3) % N_NODES, (base + 7) % N_NODES])
    edge_index = jnp.stack([src, dst])
    edge_weight = jax.random.uniform(k_ew, (edge_index.shape[1],),
                                     minval=0.5, maxval=1.5, dtype=jnp.float32)

    raw_params = make_raw_params(k_w, LAGS, FILTERS)
    packed = pack_params(raw_params, LAGS, FILTERS)

    # Graph-dependent preprocessing hoisted out of the per-step path (once per graph).
    t_fwd, t_bwd = build_transitions(edge_index, edge_weight, N_NODES)

    fwd = jax.jit(dcrnn_recurrent_gcn)

    # Case 1: exact module semantics — single step, H=None (zero hidden state).
    y1, hT1 = fwd(x_seq[:1], t_fwd, t_bwd, h0_zero, packed)
    # Case 2: fused T-step recurrent rollout with a nonzero initial state.
    y2, hT2 = fwd(x_seq, t_fwd, t_bwd, h0_rand, packed)
    jax.block_until_ready((y1, hT1, y2, hT2))

    for y, hT, xs, h0 in ((y1, hT1, x_seq[:1], h0_zero), (y2, hT2, x_seq, h0_rand)):
        y_ref, h_ref = _reference_rollout(xs, h0, t_fwd, t_bwd, raw_params)
        # bf16 matmuls with f32 accumulation vs an all-f32 reference.
        assert jnp.allclose(y, y_ref, atol=5e-2, rtol=5e-2), "y mismatch"
        assert jnp.allclose(hT, h_ref, atol=5e-2, rtol=5e-2), "h mismatch"

    print("KERNEL_OK")
</pallas_src>

<mosaic_0001>
module attributes {stable_mosaic.version = 11 : i64} {
  func.func @_dcrnn_rollout_kernel(%arg0: i32, %arg1: memref<1x16x4xbf16, #tpu.memory_space<vmem>>, %arg2: memref<16x32xf32, #tpu.memory_space<vmem>>, %arg3: memref<16x16xbf16, #tpu.memory_space<vmem>>, %arg4: memref<16x16xbf16, #tpu.memory_space<vmem>>, %arg5: memref<4x768xbf16, #tpu.memory_space<vmem>>, %arg6: memref<32x384xbf16, #tpu.memory_space<vmem>>, %arg7: memref<32x384xbf16, #tpu.memory_space<vmem>>, %arg8: memref<1x128xf32, #tpu.memory_space<vmem>>, %arg9: memref<1x128xf32, #tpu.memory_space<vmem>>, %arg10: memref<32x128xbf16, #tpu.memory_space<vmem>>, %arg11: memref<1x128xf32, #tpu.memory_space<vmem>>, %arg12: memref<16x128xf32, #tpu.memory_space<vmem>>, %arg13: memref<16x32xf32, #tpu.memory_space<vmem>>, %arg14: memref<16x32xf32, #tpu.memory_space<vmem>>, %arg15: memref<16x128xf32, #tpu.memory_space<vmem>>) attributes {dimension_semantics = [#tpu.dimension_semantics<arbitrary>], iteration_bounds = array<i64: 1>, scalar_prefetch = 0 : i64, scratch_operands = 2 : i64, tpu.core_type = #tpu.core_type<tc>, window_params = [{transform_indices = @transform_0, window_bounds = array<i64: 1, 16, 4>}, {pipeline_mode = #tpu.pipeline_mode<synchronous>, transform_indices = @transform_1, window_bounds = array<i64: 16, 32>}, {pipeline_mode = #tpu.pipeline_mode<synchronous>, transform_indices = @transform_2, window_bounds = array<i64: 16, 16>}, {pipeline_mode = #tpu.pipeline_mode<synchronous>, transform_indices = @transform_3, window_bounds = array<i64: 16, 16>}, {pipeline_mode = #tpu.pipeline_mode<synchronous>, transform_indices = @transform_4, window_bounds = array<i64: 4, 768>}, {pipeline_mode = #tpu.pipeline_mode<synchronous>, transform_indices = @transform_5, window_bounds = array<i64: 32, 384>}, {pipeline_mode = #tpu.pipeline_mode<synchronous>, transform_indices = @transform_6, window_bounds = array<i64: 32, 384>}, {pipeline_mode = #tpu.pipeline_mode<synchronous>, transform_indices = @transform_7, window_bounds = array<i64: 1, 128>}, {pipeline_mode = #tpu.pipeline_mode<synchronous>, transform_indices = @transform_8, window_bounds = array<i64: 1, 128>}, {pipeline_mode = #tpu.pipeline_mode<synchronous>, transform_indices = @transform_9, window_bounds = array<i64: 32, 128>}, {pipeline_mode = #tpu.pipeline_mode<synchronous>, transform_indices = @transform_10, window_bounds = array<i64: 1, 128>}, {pipeline_mode = #tpu.pipeline_mode<synchronous>, transform_indices = @transform_11, window_bounds = array<i64: 16, 128>}, {pipeline_mode = #tpu.pipeline_mode<synchronous>, transform_indices = @transform_12, window_bounds = array<i64: 16, 32>}]} {
    %c0_i32 = arith.constant 0 : i32
    %0 = arith.cmpi eq, %arg0, %c0_i32 : i32
    %1 = arith.extui %0 : i1 to i32
    %c0_i32_0 = arith.constant 0 : i32
    %2 = arith.cmpi ne, %1, %c0_i32_0 : i32
    scf.if %2 {
      %c0_43 = arith.constant 0 : index
      %c0_44 = arith.constant 0 : index
      %81 = vector.load %arg2[%c0_43, %c0_44] : memref<16x32xf32, #tpu.memory_space<vmem>>, vector<16x32xf32>
      %c0_45 = arith.constant 0 : index
      %c0_46 = arith.constant 0 : index
      %82 = vector.load %arg14[%c0_45, %c0_46] : memref<16x32xf32, #tpu.memory_space<vmem>>, vector<16x32xf32>
      tpu.vector_store %arg14[%c0_45, %c0_46], %81 {strides = array<i32>} : memref<16x32xf32, #tpu.memory_space<vmem>>, vector<16x32xf32>,
      %cst_47 = arith.constant 0.000000e+00 : f32
      %83 = vector.broadcast %cst_47 : f32 to vector<16x128xf32>
      %c0_48 = arith.constant 0 : index
      %c0_49 = arith.constant 0 : index
      %84 = vector.load %arg15[%c0_48, %c0_49] : memref<16x128xf32, #tpu.memory_space<vmem>>, vector<16x128xf32>
      tpu.vector_store %arg15[%c0_48, %c0_49], %83 {strides = array<i32>} : memref<16x128xf32, #tpu.memory_space<vmem>>, vector<16x128xf32>,
    } else {
    }
    %c0 = arith.constant 0 : index
    %c0_1 = arith.constant 0 : index
    %3 = vector.load %arg14[%c0, %c0_1] : memref<16x32xf32, #tpu.memory_space<vmem>>, vector<16x32xf32>
    %4 = arith.truncf %3 : vector<16x32xf32> to vector<16x32xbf16>
    %c0_2 = arith.constant 0 : index
    %c0_3 = arith.constant 0 : index
    %c0_4 = arith.constant 0 : index
    %5 = vector.load %arg1[%c0_2, %c0_3, %c0_4] : memref<1x16x4xbf16, #tpu.memory_space<vmem>>, vector<1x16x4xbf16>
    %6 = vector.shape_cast %5 : vector<1x16x4xbf16> to vector<16x4xbf16>
    %c0_5 = arith.constant 0 : index
    %c0_6 = arith.constant 0 : index
    %7 = vector.load %arg3[%c0_5, %c0_6] : memref<16x16xbf16, #tpu.memory_space<vmem>>, vector<16x16xbf16>
    %c0_7 = arith.constant 0 : index
    %c0_8 = arith.constant 0 : index
    %8 = vector.load %arg4[%c0_7, %c0_8] : memref<16x16xbf16, #tpu.memory_space<vmem>>, vector<16x16xbf16>
    %c0_9 = arith.constant 0 : index
    %c0_10 = arith.constant 0 : index
    %9 = vector.load %arg5[%c0_9, %c0_10] : memref<4x768xbf16, #tpu.memory_space<vmem>>, vector<4x768xbf16>
    %cst = arith.constant dense<0.000000e+00> : vector<16x768xf32>
    %10 = tpu.matmul %6, %9, %cst {dimension_numbers = #tpu.dot_dimension_numbers<[1], [0], [0], [1], [0, 0, 1, 1], [], []>} : vector<16x4xbf16>, vector<4x768xbf16>, vector<16x768xf32> -> vector<16x768xf32>
    %11 = vector.extract_strided_slice %10 {offsets = [0, 0], sizes = [16, 384], strides = [1, 1]} : vector<16x768xf32> to vector<16x384xf32>
    %c0_11 = arith.constant 0 : index
    %c0_12 = arith.constant 0 : index
    %12 = vector.load %arg6[%c0_11, %c0_12] : memref<32x384xbf16, #tpu.memory_space<vmem>>, vector<32x384xbf16>
    %cst_13 = arith.constant dense<0.000000e+00> : vector<16x384xf32>
    %13 = tpu.matmul %4, %12, %cst_13 {dimension_numbers = #tpu.dot_dimension_numbers<[1], [0], [0], [1], [0, 0, 1, 1], [], []>} : vector<16x32xbf16>, vector<32x384xbf16>, vector<16x384xf32> -> vector<16x384xf32>
    %14 = arith.addf %11, %13 : vector<16x384xf32>
    %15 = vector.extract_strided_slice %14 {offsets = [0, 0], sizes = [16, 128], strides = [1, 1]} : vector<16x384xf32> to vector<16x128xf32>
    %16 = vector.extract_strided_slice %14 {offsets = [0, 128], sizes = [16, 128], strides = [1, 1]} : vector<16x384xf32> to vector<16x128xf32>
    %17 = arith.truncf %16 : vector<16x128xf32> to vector<16x128xbf16>
    %cst_14 = arith.constant dense<0.000000e+00> : vector<16x128xf32>
    %18 = tpu.matmul %7, %17, %cst_14 {dimension_numbers = #tpu.dot_dimension_numbers<[1], [0], [0], [1], [0, 0, 1, 1], [], []>} : vector<16x16xbf16>, vector<16x128xbf16>, vector<16x128xf32> -> vector<16x128xf32>
    %19 = arith.addf %15, %18 : vector<16x128xf32>
    %20 = vector.extract_strided_slice %14 {offsets = [0, 256], sizes = [16, 128], strides = [1, 1]} : vector<16x384xf32> to vector<16x128xf32>
    %21 = arith.truncf %20 : vector<16x128xf32> to vector<16x128xbf16>
    %cst_15 = arith.constant dense<0.000000e+00> : vector<16x128xf32>
    %22 = tpu.matmul %8, %21, %cst_15 {dimension_numbers = #tpu.dot_dimension_numbers<[1], [0], [0], [1], [0, 0, 1, 1], [], []>} : vector<16x16xbf16>, vector<16x128xbf16>, vector<16x128xf32> -> vector<16x128xf32>
    %23 = arith.addf %19, %22 : vector<16x128xf32>
    %c0_16 = arith.constant 0 : index
    %c0_17 = arith.constant 0 : index
    %24 = vector.load %arg8[%c0_16, %c0_17] : memref<1x128xf32, #tpu.memory_space<vmem>>, vector<1x128xf32>
    %25 = vector.broadcast %24 : vector<1x128xf32> to vector<16x128xf32>
    %26 = arith.addf %23, %25 : vector<16x128xf32>
    %27 = arith.negf %26 : vector<16x128xf32>
    %28 = math.exp %27 : vector<16x128xf32>
    %cst_18 = arith.constant 1.000000e+00 : f32
    %29 = vector.broadcast %cst_18 : f32 to vector<16x128xf32>
    %30 = arith.addf %29, %28 : vector<16x128xf32>
    %31 = arith.divf %29, %30 : vector<16x128xf32>
    %32 = vector.extract_strided_slice %31 {offsets = [0, 0], sizes = [16, 32], strides = [1, 1]} : vector<16x128xf32> to vector<16x32xf32>
    %33 = vector.extract_strided_slice %31 {offsets = [0, 32], sizes = [16, 32], strides = [1, 1]} : vector<16x128xf32> to vector<16x32xf32>
    %34 = arith.mulf %3, %33 : vector<16x32xf32>
    %35 = arith.truncf %34 : vector<16x32xf32> to vector<16x32xbf16>
    %36 = vector.extract_strided_slice %10 {offsets = [0, 384], sizes = [16, 384], strides = [1, 1]} : vector<16x768xf32> to vector<16x384xf32>
    %c0_19 = arith.constant 0 : index
    %c0_20 = arith.constant 0 : index
    %37 = vector.load %arg7[%c0_19, %c0_20] : memref<32x384xbf16, #tpu.memory_space<vmem>>, vector<32x384xbf16>
    %cst_21 = arith.constant dense<0.000000e+00> : vector<16x384xf32>
    %38 = tpu.matmul %35, %37, %cst_21 {dimension_numbers = #tpu.dot_dimension_numbers<[1], [0], [0], [1], [0, 0, 1, 1], [], []>} : vector<16x32xbf16>, vector<32x384xbf16>, vector<16x384xf32> -> vector<16x384xf32>
    %39 = arith.addf %36, %38 : vector<16x384xf32>
    %40 = vector.extract_strided_slice %39 {offsets = [0, 0], sizes = [16, 128], strides = [1, 1]} : vector<16x384xf32> to vector<16x128xf32>
    %41 = vector.extract_strided_slice %39 {offsets = [0, 128], sizes = [16, 128], strides = [1, 1]} : vector<16x384xf32> to vector<16x128xf32>
    %42 = arith.truncf %41 : vector<16x128xf32> to vector<16x128xbf16>
    %cst_22 = arith.constant dense<0.000000e+00> : vector<16x128xf32>
    %43 = tpu.matmul %7, %42, %cst_22 {dimension_numbers = #tpu.dot_dimension_numbers<[1], [0], [0], [1], [0, 0, 1, 1], [], []>} : vector<16x16xbf16>, vector<16x128xbf16>, vector<16x128xf32> -> vector<16x128xf32>
    %44 = arith.addf %40, %43 : vector<16x128xf32>
    %45 = vector.extract_strided_slice %39 {offsets = [0, 256], sizes = [16, 128], strides = [1, 1]} : vector<16x384xf32> to vector<16x128xf32>
    %46 = arith.truncf %45 : vector<16x128xf32> to vector<16x128xbf16>
    %cst_23 = arith.constant dense<0.000000e+00> : vector<16x128xf32>
    %47 = tpu.matmul %8, %46, %cst_23 {dimension_numbers = #tpu.dot_dimension_numbers<[1], [0], [0], [1], [0, 0, 1, 1], [], []>} : vector<16x16xbf16>, vector<16x128xbf16>, vector<16x128xf32> -> vector<16x128xf32>
    %48 = arith.addf %44, %47 : vector<16x128xf32>
    %c0_24 = arith.constant 0 : index
    %c0_25 = arith.constant 0 : index
    %49 = vector.load %arg9[%c0_24, %c0_25] : memref<1x128xf32, #tpu.memory_space<vmem>>, vector<1x128xf32>
    %50 = vector.broadcast %49 : vector<1x128xf32> to vector<16x128xf32>
    %51 = arith.addf %48, %50 : vector<16x128xf32>
    %52 = math.tanh %51 : vector<16x128xf32>
    %53 = vector.extract_strided_slice %52 {offsets = [0, 0], sizes = [16, 32], strides = [1, 1]} : vector<16x128xf32> to vector<16x32xf32>
    %54 = arith.mulf %32, %3 : vector<16x32xf32>
    %cst_26 = arith.constant 1.000000e+00 : f32
    %55 = vector.broadcast %cst_26 : f32 to vector<16x32xf32>
    %56 = arith.subf %55, %32 : vector<16x32xf32>
    %57 = arith.mulf %56, %53 : vector<16x32xf32>
    %58 = arith.addf %54, %57 : vector<16x32xf32>
    %c0_27 = arith.constant 0 : index
    %c0_28 = arith.constant 0 : index
    %59 = vector.load %arg14[%c0_27, %c0_28] : memref<16x32xf32, #tpu.memory_space<vmem>>, vector<16x32xf32>
    tpu.vector_store %arg14[%c0_27, %c0_28], %58 {strides = array<i32>} : memref<16x32xf32, #tpu.memory_space<vmem>>, vector<16x32xf32>,
    %c0_29 = arith.constant 0 : index
    %c0_30 = arith.constant 0 : index
    %60 = vector.load %arg13[%c0_29, %c0_30] : memref<16x32xf32, #tpu.memory_space<vmem>>, vector<16x32xf32>
    tpu.vector_store %arg13[%c0_29, %c0_30], %58 {strides = array<i32>} : memref<16x32xf32, #tpu.memory_space<vmem>>, vector<16x32xf32>,
    %cst_31 = arith.constant 0.000000e+00 : f32
    %61 = vector.broadcast %cst_31 : f32 to vector<16x32xf32>
    %62 = arith.maximumf %58, %61 : vector<16x32xf32>
    %63 = arith.truncf %62 : vector<16x32xf32> to vector<16x32xbf16>
    %c0_32 = arith.constant 0 : index
    %c0_33 = arith.constant 0 : index
    %64 = vector.load %arg10[%c0_32, %c0_33] : memref<32x128xbf16, #tpu.memory_space<vmem>>, vector<32x128xbf16>
    %cst_34 = arith.constant dense<0.000000e+00> : vector<16x128xf32>
    %65 = tpu.matmul %63, %64, %cst_34 {dimension_numbers = #tpu.dot_dimension_numbers<[1], [0], [0], [1], [0, 0, 1, 1], [], []>} : vector<16x32xbf16>, vector<32x128xbf16>, vector<16x128xf32> -> vector<16x128xf32>
    %c0_35 = arith.constant 0 : index
    %c0_36 = arith.constant 0 : index
    %66 = vector.load %arg11[%c0_35, %c0_36] : memref<1x128xf32, #tpu.memory_space<vmem>>, vector<1x128xf32>
    %67 = vector.broadcast %66 : vector<1x128xf32> to vector<16x128xf32>
    %68 = arith.addf %65, %67 : vector<16x128xf32>
    %69 = vector.extract_strided_slice %68 {offsets = [0, 0], sizes = [16, 1], strides = [1, 1]} : vector<16x128xf32> to vector<16x1xf32>
    %70 = tpu.iota {dimensions = array<i32: 1>} : vector<16x128xi32>
    %71 = vector.broadcast %arg0 : i32 to vector<16x128xi32>
    %72 = arith.cmpi eq, %70, %71 : vector<16x128xi32>
    %c0_37 = arith.constant 0 : index
    %c0_38 = arith.constant 0 : index
    %73 = vector.load %arg15[%c0_37, %c0_38] : memref<16x128xf32, #tpu.memory_space<vmem>>, vector<16x128xf32>
    %74 = vector.shape_cast %69 : vector<16x1xf32> to vector<16x1xf32>
    %75 = vector.broadcast %74 : vector<16x1xf32> to vector<16x128xf32>
    %76 = arith.select %72, %75, %73 : vector<16x128xi1>, vector<16x128xf32>
    %c0_39 = arith.constant 0 : index
    %c0_40 = arith.constant 0 : index
    %77 = vector.load %arg15[%c0_39, %c0_40] : memref<16x128xf32, #tpu.memory_space<vmem>>, vector<16x128xf32>
    tpu.vector_store %arg15[%c0_39, %c0_40], %76 {strides = array<i32>} : memref<16x128xf32, #tpu.memory_space<vmem>>, vector<16x128xf32>,
    %c0_i32_41 = arith.constant 0 : i32
    %78 = arith.cmpi eq, %arg0, %c0_i32_41 : i32
    %79 = arith.extui %78 : i1 to i32
    %c0_i32_42 = arith.constant 0 : i32
    %80 = arith.cmpi ne, %79, %c0_i32_42 : i32
    scf.if %80 {
      %c0_43 = arith.constant 0 : index
      %c0_44 = arith.constant 0 : index
      %81 = vector.load %arg15[%c0_43, %c0_44] : memref<16x128xf32, #tpu.memory_space<vmem>>, vector<16x128xf32>
      %c0_45 = arith.constant 0 : index
      %c0_46 = arith.constant 0 : index
      %82 = vector.load %arg12[%c0_45, %c0_46] : memref<16x128xf32, #tpu.memory_space<vmem>>, vector<16x128xf32>
      tpu.vector_store %arg12[%c0_45, %c0_46], %81 {strides = array<i32>} : memref<16x128xf32, #tpu.memory_space<vmem>>, vector<16x128xf32>,
    } else {
    }
    return
  }
  func.func @transform_0(%arg0: i32) -> (i32, i32, i32) {
    %c0_i32 = arith.constant 0 : i32
    %c0_i32_0 = arith.constant 0 : i32
    %c0_i32_1 = arith.constant 0 : i32
    return %arg0, %c0_i32, %c0_i32_0 : i32, i32, i32
  }
  func.func @transform_1(%arg0: i32) -> (i32, i32) {
    %c0_i32 = arith.constant 0 : i32
    %c0_i32_0 = arith.constant 0 : i32
    %c0_i32_1 = arith.constant 0 : i32
    return %c0_i32, %c0_i32_0 : i32, i32
  }
  func.func @transform_2(%arg0: i32) -> (i32, i32) {
    %c0_i32 = arith.constant 0 : i32
    %c0_i32_0 = arith.constant 0 : i32
    %c0_i32_1 = arith.constant 0 : i32
    return %c0_i32, %c0_i32_0 : i32, i32
  }
  func.func @transform_3(%arg0: i32) -> (i32, i32) {
    %c0_i32 = arith.constant 0 : i32
    %c0_i32_0 = arith.constant 0 : i32
    %c0_i32_1 = arith.constant 0 : i32
    return %c0_i32, %c0_i32_0 : i32, i32
  }
  func.func @transform_4(%arg0: i32) -> (i32, i32) {
    %c0_i32 = arith.constant 0 : i32
    %c0_i32_0 = arith.constant 0 : i32
    %c0_i32_1 = arith.constant 0 : i32
    return %c0_i32, %c0_i32_0 : i32, i32
  }
  func.func @transform_5(%arg0: i32) -> (i32, i32) {
    %c0_i32 = arith.constant 0 : i32
    %c0_i32_0 = arith.constant 0 : i32
    %c0_i32_1 = arith.constant 0 : i32
    return %c0_i32, %c0_i32_0 : i32, i32
  }
  func.func @transform_6(%arg0: i32) -> (i32, i32) {
    %c0_i32 = arith.constant 0 : i32
    %c0_i32_0 = arith.constant 0 : i32
    %c0_i32_1 = arith.constant 0 : i32
    return %c0_i32, %c0_i32_0 : i32, i32
  }
  func.func @transform_7(%arg0: i32) -> (i32, i32) {
    %c0_i32 = arith.constant 0 : i32
    %c0_i32_0 = arith.constant 0 : i32
    %c0_i32_1 = arith.constant 0 : i32
    return %c0_i32, %c0_i32_0 : i32, i32
  }
  func.func @transform_8(%arg0: i32) -> (i32, i32) {
    %c0_i32 = arith.constant 0 : i32
    %c0_i32_0 = arith.constant 0 : i32
    %c0_i32_1 = arith.constant 0 : i32
    return %c0_i32, %c0_i32_0 : i32, i32
  }
  func.func @transform_9(%arg0: i32) -> (i32, i32) {
    %c0_i32 = arith.constant 0 : i32
    %c0_i32_0 = arith.constant 0 : i32
    %c0_i32_1 = arith.constant 0 : i32
    return %c0_i32, %c0_i32_0 : i32, i32
  }
  func.func @transform_10(%arg0: i32) -> (i32, i32) {
    %c0_i32 = arith.constant 0 : i32
    %c0_i32_0 = arith.constant 0 : i32
    %c0_i32_1 = arith.constant 0 : i32
    return %c0_i32, %c0_i32_0 : i32, i32
  }
  func.func @transform_11(%arg0: i32) -> (i32, i32) {
    %c0_i32 = arith.constant 0 : i32
    %c0_i32_0 = arith.constant 0 : i32
    %c0_i32_1 = arith.constant 0 : i32
    return %c0_i32, %c0_i32_0 : i32, i32
  }
  func.func @transform_12(%arg0: i32) -> (i32, i32) {
    %c0_i32 = arith.constant 0 : i32
    %c0_i32_0 = arith.constant 0 : i32
    %c0_i32_1 = arith.constant 0 : i32
    return %c0_i32, %c0_i32_0 : i32, i32
  }
}

</mosaic_0001>

<bundles_post_ra>
// kernel: dcrnn_recurrent_gcn.1
= control target key start
LH: loop header
LB: loop body
LE: loop exit
PB: predicated region body
PF: predicated region fallthrough
CT: control target
= control target key end

     0   :  { %18 = vsyncpa [#allocation5], 0  ;;  %s1091_s0 = inlined_call_operand.vmem [shape: bf16[1,16,4], index: 0, kind: input, shape index: {}]   ;;  %s1092_s1 = inlined_call_operand.vmem [shape: f32[16,32], index: 1, kind: input, shape index: {}]   ;;  %s1093_s2 = inlined_call_operand.vmem [shape: bf16[16,16], index: 2, kind: input, shape index: {}]   ;;  %s1094_s3 = inlined_call_operand.vmem [shape: bf16[16,16], index: 3, kind: input, shape index: {}]   ;;  %s1095_s4 = inlined_call_operand.hbm [shape: bf16[4,768], index: 4, kind: input, shape index: {}]   ;;  %s1096_s5 = inlined_call_operand.hbm [shape: bf16[32,384], index: 5, kind: input, shape index: {}]   ;;  %s1097_s6 = inlined_call_operand.hbm [shape: bf16[32,384], index: 6, kind: input, shape index: {}]   ;;  %s1098_s7 = inlined_call_operand.vmem [shape: f32[1,128], index: 7, kind: input, shape index: {}]   ;;  %s1099_s8 = inlined_call_operand.vmem [shape: f32[1,128], index: 8, kind: input, shape index: {}]   ;;  %s1100_s9 = inlined_call_operand.vmem [shape: bf16[32,128], index: 9, kind: input, shape index: {}]   ;;  %s1101_s10 = inlined_call_operand.vmem [shape: f32[1,128], index: 10, kind: input, shape index: {}]   ;;  %s1102_s11 = inlined_call_operand.vmem [shape: f32[16,128], index: 11, kind: output, shape index: {0}]   ;;  %s1103_s12 = inlined_call_operand.hbm [shape: f32[16,32], index: 12, kind: output, shape index: {1}]  }
   0x1   :  { %19 = vsyncpa [#allocation8], 0  ;;  %s44_s23 = sshll.u32 %s1096_s5, 4  ;;  %s45_s23 = int_to_ptr.hbm [resolvable:$true] %s44_s23 }
   0x2   :  { %20 = vsyncpa [#allocation6], 0  ;;  %s893_s24 = smov [#allocation7]   ;;  %s34_s28 = sshll.u32 %s1095_s4, 4  ;;  %s35_s28 = int_to_ptr.hbm [resolvable:$true] %s34_s28 }
   0x3   :  { %s46_s25 = sshll.u32 %s893_s24, 4  ;;  %s894_s29 = smov 192   ;;  %s47_s25 = int_to_ptr.vmem [resolvable:$true] %s46_s25 }
   0x4   :  { %s895_s30 = smov 12   ;;  %s896_s13 = smov [#allocation4]  }
   0x5   :  { %52 = dma.hbm_to_vmem [thread:$0]  %s45_s23, 768, %s47_s25, [#allocation8], %s894_s29, %s894_s29, %s895_s30  }
   0x6   :  { %s36_s14 = sshll.u32 %s896_s13, 4  ;;  %s57_s17 = sshll.u32 %s1097_s6, 4  ;;  %s37_s14 = int_to_ptr.vmem [resolvable:$true] %s36_s14  ;;  %s58_s17 = int_to_ptr.hbm [resolvable:$true] %s57_s17 }
   0x7   :  { %39 = dma.hbm_to_vmem [thread:$0]  %s35_s28, 192, %s37_s14, [#allocation5]  }
   0x8   :  { %s897_s5 = smov [#allocation9]  }
   0x9   :  { %s59_s18 = sshll.u32 %s897_s5, 4  ;;  %s60_s18 = int_to_ptr.vmem [resolvable:$true] %s59_s18 }
   0xa   :  { %65 = dma.hbm_to_vmem [thread:$0]  %s58_s17, 768, %s60_s18, [#allocation8], %s894_s29, %s894_s29, %s895_s30  }
   0xb   :  { %887 = dma.done.wait [#allocation5], 192  }
   0xc   :  { %888 = vsyncadd [#allocation5], 4294967104 }
   0xd   :  { %889 = dma.done.wait [#allocation8], 1536  }
   0xe   :  { %890 = vsyncadd [#allocation8], 4294965760  ;;  %v107_v0 = vld [vmem:[#allocation4] sm:$0xff]  ;;  %v108_v1 = vld [vmem:[#allocation4 + $0x8] sm:$0xf]  ;;  %vm93_vm0 = vcmask 261120  }
   0xf   :  { %115 = vst [vmem:[#allocation1] ss:$4 sm:$0xff] %v107_v0  ;;  %v684_v2 = vld [vmem:[#allocation7 + $0x18] sm:$0xf]  ;;  %v754_v3 = vld [vmem:[#allocation7 + $0x20] sm:$0xf0] }
  0x10   :  { %118 = vst [vmem:[#allocation1 + $0x20] ss:$4 sm:$0xff] %v108_v1  ;;  %v91_v4 = vld [vmem:[%s1092_s1] sm:$0xff]  ;;  %v92_v5 = vld [vmem:[%s1092_s1 + $0x8] sm:$0xff]  ;;  %vm129_vm1 = vcmask 1041408   ;;  %v685_v12 = vor.u32 %v754_v3, %v684_v2  ;;  %vm125_vm2 = vcmask 31744  }
  0x11   :  { %v753_v6 = vld [vmem:[#allocation7 + $0x1c] sm:$0xf]  ;;  %v686_v7 = vld [vmem:[#allocation7 + $0x24] sm:$0xf0]  ;;  %94 = vst.msk [vmem:[#allocation2] sm:$0xff] %vm93_vm0, %v91_v4  ;;  %vm324_vm3 = vcmask 130048  }
  0x12   :  { %v672_v8 = vld [vmem:[#allocation7] sm:$0xf]  ;;  %v751_v9 = vld [vmem:[#allocation7 + $0x8] sm:$0xf0]  ;;  %95 = vst.msk [vmem:[#allocation2 + $0x8] sm:$0xff] %vm93_vm0, %v92_v5  ;;  %v689_v17 = vor.u32 %v753_v6, %v686_v7  ;;  %s900_s13 = smov [#allocation10]  }
  0x13   :  { %v692_v10 = vld [vmem:[#allocation7 + $0x20] sm:$0xf]  ;;  %v755_v11 = vld [vmem:[#allocation7 + $0x28] sm:$0xf0]  ;;  %v750_v13 = vld [vmem:[#allocation7 + $0x4] sm:$0xf]  ;;  %v673_v25 = vor.u32 %v751_v9, %v672_v8 }
  0x14   :  { %v674_v14 = vld [vmem:[#allocation7 + $0xc] sm:$0xf0]  ;;  %v747_v21 = vld [vmem:[%s1091_s0] sm:$0xff]  ;;  %v693_v27 = vor.u32 %v755_v11, %v692_v10  ;;  %v680_v30 = vld [vmem:[#allocation7 + $0x8] sm:$0xf]  ;;  %s642_s14 = sshll.u32 %s900_s13, 4  ;;  %s643_s14 = int_to_ptr.vmem [resolvable:$true] %s642_s14 }
  0x15   :  { %v677_v28 = vor.u32 %v750_v13, %v674_v14  ;;  %v752_v31 = vld [vmem:[#allocation7 + $0x10] sm:$0xf0]  ;;  %v1020_v53 = vld [vmem:[%s1093_s2] sm:$0xff]  ;;  %s644_s17 = sshll.u32 %s1103_s12, 4  ;;  %s901_s5 = smov 128   ;;  %s645_s17 = int_to_ptr.hbm [resolvable:$true] %s644_s17 }
  0x16   :  { %v119_v15 = vld.sshfl [vmem:[#allocation1] sm:$0xff pattern:$0x73625140]  ;;  %v121_v16 = vld.sshfl [vmem:[#allocation1 + $0x10] sm:$0xff pattern:$0x73625140]  ;;  %v681_v32 = vor.u32 %v752_v31, %v680_v30 }
  0x17   :  { %v130_v18 = vsel %vm129_vm1, %v119_v15, 0  ;;  %v134_v19 = vsel %vm129_vm1, %v121_v16, 0  ;;  %v122_v20 = vld.sshfl [vmem:[#allocation1 + $0x18] sm:$0xff pattern:$0x73625140]  ;;  %v1027_v59 = vld [vmem:[%s1094_s3] sm:$0xff] }
  0x18   :  { %149 = vmatpush.bf16.msra.mxu0 %v130_v18  ;;  %177 = vmatpush.bf16.msra.mxu2 %v134_v19  ;;  %v136_v22 = vsel %vm129_vm1, %v122_v20, 0  ;;  %v123_v23 = vld.sshfl [vmem:[#allocation1 + $0x20] sm:$0xff pattern:$0x73625140]  ;;  %v997_v33 = vld [vmem:[#allocation2] sm:$0xff]  ;;  %s898_s3 = smov 96  }
  0x19   :  { %191 = vmatpush.bf16.msra.mxu3 %v136_v22  ;;  %v138_v24 = vsel %vm129_vm1, %v123_v23, 0  ;;  %v120_v26 = vld.sshfl [vmem:[#allocation1 + $0x8] sm:$0xff pattern:$0x73625140]  ;;  %v999_v34 = vld [vmem:[#allocation2 + $0x8] sm:$0xff]  ;;  %s902_s18 = smov 8  }
  0x1a   :  { %v132_v29 = vsel %vm129_vm1, %v120_v26, 0  ;;  %v100_v35 = vpack.c.bf16 %v999_v34, %v997_v33  ;;  %v124_v36 = vld.sshfl [vmem:[#allocation1 + $0x28] sm:$0xff pattern:$0x73625140]  ;;  %v776_v3 = vld [vmem:[%s1098_s7] ss:$0 sm:$0xff] }
  0x1b   :  { %664 = vmatmul.msk.bf16.vlgmr.msra.gmra.mxu0 %vm125_vm2, %v747_v21  ;;  %666 = vmatmul.msk.bf16.vlgmr.msra.gmra.mxu2 %vm125_vm2, %v747_v21  ;;  %v140_v37 = vsel %vm129_vm1, %v124_v36, 0 }
  0x1c   :  { %276 = vmatpush.bf16.msrb.mxu2 %v685_v12  ;;  %205 = vmatpush.bf16.msrb.mxu0 %v138_v24 }
  0x1d   :  { %290 = vmatpush.bf16.msrb.mxu3 %v689_v17  ;;  %163 = vmatpush.bf16.msra.mxu1 %v132_v29 }
  0x1e   :  { %667 = vmatmul.msk.bf16.vlgmr.msra.gmra.mxu3 %vm125_vm2, %v747_v21 }
  0x20   :  { %277 = vmatpush.bf16.msrb.mxu2 %v673_v25  ;;  %304 = vmatpush.bf16.msra.mxu0 %v693_v27 }
  0x21   :  { %291 = vmatpush.bf16.msrb.mxu3 %v677_v28  ;;  %665 = vmatmul.msk.bf16.vlgmr.msra.gmra.mxu1 %vm125_vm2, %v747_v21 }
  0x22   :  { %219 = vmatpush.bf16.msrb.mxu1 %v140_v37 }
  0x24   :  { %305 = vmatpush.bf16.msra.mxu0 %v681_v32 }
  0x2b   :  { %668 = vmatmul.msk.bf16.vlgmr.msrb.gmra.mxu0 %vm125_vm2, %v747_v21  ;;  %694 = vmatmul.msk.bf16.vlgmr.msrb.gmra.mxu2 %vm93_vm0, %v100_v35 }
  0x2e   :  { %695 = vmatmul.msk.bf16.vlgmr.msrb.gmra.mxu3 %vm93_vm0, %v100_v35 }
  0x31   :  { %669 = vmatmul.msk.bf16.vlgmr.msrb.gmra.mxu1 %vm125_vm2, %v747_v21 }
  0x3b   :  { %696 = vmatmul.msk.bf16.vlgmr.msra.gmra.mxu0 %vm93_vm0, %v100_v35 }
  0x98   :  { %v151_v38 = vpop.f32.mrf.mxu0 }
  0x9e   :  { %v165_v43 = vpop.f32.mrf.mxu1  ;;  %v179_v47 = vpop.f32.mrf.mxu2 }
  0xa0   :  { %v153_v40 = vpop.f32.mrf.mxu0 }
  0xa1   :  { %v1009_v39 = vpop.f32.mrf.mxu3 }
  0xa6   :  { %v167_v46 = vpop.f32.mrf.mxu1  ;;  %v181_v54 = vpop.f32.mrf.mxu2 }
  0xa8   :  { %v1013_v42 = vpop.f32.mrf.mxu0 }
  0xa9   :  { %v1011_v41 = vpop.f32.mrf.mxu3 }
  0xae   :  { %v1031_v60 = vpop.f32.mrf.mxu1  ;;  %v279_v61 = vpop.f32.mrf.mxu2 }
  0xaf   :  { %v312_v1 = vadd.f32 %v279_v61, %v151_v38  ;;  %v713_v61 = vld [vmem:[#allocation9 + $0xc] sm:$0xf0] }
  0xb0   :  { %v1015_v45 = vpop.f32.mrf.mxu0 }
  0xb1   :  { %v293_v44 = vpop.f32.mrf.mxu3 }
  0xb2   :  { %v313_v48 = vadd.f32 %v293_v44, %v165_v43  ;;  %v723_v44 = vld [vmem:[#allocation9 + $0x18] sm:$0xf] }
  0xb6   :  { %v1033_v62 = vpop.f32.mrf.mxu1  ;;  %v281_v63 = vpop.f32.mrf.mxu2 }
  0xb7   :  { %v315_v8 = vadd.f32 %v281_v63, %v153_v40  ;;  %v719_v63 = vld [vmem:[#allocation9 + $0x8] sm:$0xf] }
  0xb8   :  { %v307_v51 = vpop.f32.mrf.mxu0 }
  0xb9   :  { %v295_v49 = vpop.f32.mrf.mxu3  ;;  %v314_v56 = vadd.f32 %v307_v51, %v179_v47  ;;  %v759_v47 = vld [vmem:[#allocation9 + $0x1c] sm:$0xf]  ;;  %v761_v51 = vld [vmem:[#allocation9 + $0x28] sm:$0xf0] }
  0xba   :  { %v316_v50 = vadd.f32 %v295_v49, %v167_v46  ;;  %v760_v46 = vld [vmem:[#allocation9 + $0x20] sm:$0xf0]  ;;  %v725_v49 = vld [vmem:[#allocation9 + $0x24] sm:$0xf0] }
  0xbc   :  { %v318_v52 = vpack.c.bf16 %v316_v50, %v313_v48  ;;  %v724_v48 = vor.u32 %v760_v46, %v723_v44  ;;  %v731_v50 = vld [vmem:[#allocation9 + $0x20] sm:$0xf] }
  0xbe   :  { %335 = vmatpush.bf16.msra.mxu1 %v318_v52  ;;  %v728_v52 = vor.u32 %v759_v47, %v725_v49  ;;  %473 = vmatpush.bf16.msra.mxu3 %v724_v48  ;;  %v778_v47 = vld [vmem:[%s1101_s10] ss:$0 sm:$0xff] }
  0xc0   :  { %v309_v55 = vpop.f32.mrf.mxu0  ;;  %487 = vmatpush.bf16.msrb.mxu0 %v728_v52 }
  0xc1   :  { %701 = vmatmul.msk.bf16.vlgmr.msra.gmra.mxu1 %vm324_vm3, %v1020_v53  ;;  %v317_v57 = vadd.f32 %v309_v55, %v181_v54  ;;  %v732_v54 = vor.u32 %v761_v51, %v731_v50  ;;  %v711_v55 = vld [vmem:[#allocation9] sm:$0xf]  ;;  %v609_v50 = vlaneseq }
  0xc3   :  { %v344_v58 = vpack.c.bf16 %v317_v57, %v314_v56  ;;  %501 = vmatpush.bf16.msrb.mxu1 %v732_v54  ;;  %v757_v56 = vld [vmem:[#allocation9 + $0x8] sm:$0xf0]  ;;  %v756_v57 = vld [vmem:[#allocation9 + $0x4] sm:$0xf]  ;;  %v610_v51 = vand.u32 127, %v609_v50 }
  0xc5   :  { %360 = vmatpush.bf16.msra.mxu2 %v344_v58  ;;  %v712_v58 = vor.u32 %v757_v56, %v711_v55  ;;  %vm612_vm12 = vcmp.eq.s32.totalorder %v610_v51, 0 }
  0xc7   :  { %474 = vmatpush.bf16.msra.mxu3 %v712_v58 }
  0xc8   :  { %706 = vmatmul.msk.bf16.vlgmr.msra.gmra.mxu2 %vm324_vm3, %v1027_v59 }
 0x13e   :  { %v337_v0 = vpop.f32.mrf.mxu1 }
 0x13f   :  { %v342_v2 = vadd.f32 %v337_v0, %v312_v1  ;;  %v758_v0 = vld [vmem:[#allocation9 + $0x10] sm:$0xf0]  ;;  %v716_v1 = vor.u32 %v756_v57, %v713_v61 }
 0x141   :  { %488 = vmatpush.bf16.msrb.mxu0 %v716_v1 }
 0x146   :  { %v339_v7 = vpop.f32.mrf.mxu1 }
 0x147   :  { %v343_v10 = vadd.f32 %v339_v7, %v315_v8 }
 0x14b   :  { %v362_v4 = vpop.f32.mrf.mxu2 }
 0x14c   :  { %v367_v5 = vadd.f32 %v362_v4, %v342_v2  ;;  %v720_v2 = vor.u32 %v758_v0, %v719_v63 }
 0x14e   :  { %v373_v6 = vadd.f32 %v776_v3, %v367_v5  ;;  %502 = vmatpush.bf16.msrb.mxu1 %v720_v2 }
 0x150   :  { %v707_v9 = vmul.f32 -1.442695, %v373_v6 }
 0x152   :  { %779 = vpow2.f32 %v707_v9 }
 0x153   :  { %v364_v11 = vpop.f32.mrf.mxu2 }
 0x154   :  { %v368_v12 = vadd.f32 %v364_v11, %v343_v10 }
 0x156   :  { %v374_v13 = vadd.f32 %v776_v3, %v368_v12 }
 0x158   :  { %v780_v14 = vpop.eup %779  ;;  %v708_v15 = vmul.f32 -1.442695, %v374_v13 }
 0x159   :  { %v381_v16 = vadd.f32 1.0, %v780_v14 }
 0x15a   :  { %781 = vpow2.f32 %v708_v15 }
 0x15b   :  { %783 = vrcp.f32 %v381_v16  ;;  %v394_v22 = vand.u32 2147483648, %v381_v16  ;;  %v392_v24 = vand.u32 2147483647, %v381_v16  ;;  %vm388_vm5 = vweird.f32 %v381_v16 }
 0x15d   :  { %v395_v27 = vor.u32 1.1754944e-38, %v394_v22  ;;  %vm393_vm7 = vcmp.eq.f32.partialorder %v392_v24, 8.507059e+37 }
 0x160   :  { %v782_v17 = vpop.eup %781 }
 0x161   :  { %v784_v18 = vpop.eup %783  ;;  %v382_v19 = vadd.f32 1.0, %v782_v17 }
 0x162   :  { %v384_v20 = vmul.f32 %v784_v18, %v381_v16  ;;  %vm389_vm4 = vweird.f32 %v784_v18 }
 0x163   :  { %785 = vrcp.f32 %v382_v19  ;;  %vm390_vm6 = vmor %vm388_vm5, %vm389_vm4  ;;  %v409_v32 = vand.u32 2147483648, %v382_v19  ;;  %v407_v36 = vand.u32 2147483647, %v382_v19  ;;  %vm403_vm9 = vweird.f32 %v382_v19 }
 0x164   :  { %v385_v21 = vsub.f32 1.0, %v384_v20 }
 0x165   :  { %v410_v38 = vor.u32 1.1754944e-38, %v409_v32  ;;  %vm408_vm11 = vcmp.eq.f32.partialorder %v407_v36, 8.507059e+37 }
 0x166   :  { %v386_v23 = vmul.f32 %v784_v18, %v385_v21 }
 0x168   :  { %v387_v25 = vadd.f32 %v784_v18, %v386_v23 }
 0x169   :  { %v786_v26 = vpop.eup %785 }
 0x16a   :  { %v391_v28 = vsel %vm390_vm6, %v784_v18, %v387_v25  ;;  %v399_v29 = vmul.f32 %v786_v26, %v382_v19  ;;  %vm404_vm8 = vweird.f32 %v786_v26 }
 0x16b   :  { %v1038_v30 = vsel %vm393_vm7, %v395_v27, %v391_v28  ;;  %vm405_vm10 = vmor %vm403_vm9, %vm404_vm8 }
 0x16c   :  { %415 = vrot.lane.b32.xlu0 %v1038_v30, %s898_s3  ;;  %v400_v31 = vsub.f32 1.0, %v399_v29  ;;  %v559_v28 = vsub.f32 1.0, %v1038_v30 }
 0x16e   :  { %v401_v35 = vmul.f32 %v786_v26, %v400_v31  ;;  %v557_v31 = vmul.f32 %v1038_v30, %v997_v33  ;;  %v899_v30 = vmov 0  }
 0x16f   :  { %774 = vset.pattern.permute.xlu1 %v899_v30  ;;  %775 = vset.pattern.permute.xlu0 %v899_v30 }
 0x170   :  { %v402_v37 = vadd.f32 %v786_v26, %v401_v35 }
 0x172   :  { %v406_v40 = vsel %vm405_vm10, %v786_v26, %v402_v37 }
 0x173   :  { %v1041_v43 = vsel %vm408_vm11, %v410_v38, %v406_v40 }
 0x174   :  { %417 = vrot.lane.b32.xlu0 %v1041_v43, %s898_s3  ;;  %v558_v37 = vmul.f32 %v1041_v43, %v999_v34 }
 0x1de   :  { %v416_v3 = vpop.permute.xlu0 %415 }
 0x1df   :  { %v421_v5 = vmul.f32 %v416_v3, %v997_v33 }
 0x1e6   :  { %v418_v4 = vpop.permute.xlu0 %417 }
 0x1e7   :  { %v422_v6 = vmul.f32 %v418_v4, %v999_v34 }
 0x1e9   :  { %v423_v7 = vpack.c.bf16 %v422_v6, %v421_v5 }
 0x1eb   :  { %733 = vmatmul.msk.bf16.vlgmr.msra.gmra.mxu3 %vm93_vm0, %v423_v7  ;;  %734 = vmatmul.msk.bf16.vlgmr.msrb.gmra.mxu0 %vm93_vm0, %v423_v7 }
 0x1ec   :  { %735 = vmatmul.msk.bf16.vlgmr.msrb.gmra.mxu1 %vm93_vm0, %v423_v7 }
 0x268   :  { %v490_v8 = vpop.f32.mrf.mxu0 }
 0x269   :  { %v504_v9 = vpop.f32.mrf.mxu1  ;;  %v510_v11 = vadd.f32 %v490_v8, %v1013_v42  ;;  %v763_v42 = vld [vmem:[%s1100_s9 + $0x8] sm:$0xff] }
 0x26a   :  { %v511_v14 = vadd.f32 %v504_v9, %v1031_v60  ;;  %601 = vmatpush.bf16.msra.mxu0 %v763_v42  ;;  %v762_v60 = vld [vmem:[%s1100_s9] sm:$0xff] }
 0x26e   :  { %v476_v18 = vpop.f32.mrf.mxu3  ;;  %602 = vmatpush.bf16.msra.mxu0 %v762_v60 }
 0x270   :  { %v492_v10 = vpop.f32.mrf.mxu0 }
 0x271   :  { %v513_v12 = vadd.f32 %v492_v10, %v1015_v45  ;;  %v506_v13 = vpop.f32.mrf.mxu1 }
 0x272   :  { %v514_v15 = vadd.f32 %v506_v13, %v1033_v62  ;;  %v509_v62 = vadd.f32 %v476_v18, %v1009_v39 }
 0x273   :  { %v515_v16 = vpack.c.bf16 %v513_v12, %v510_v11 }
 0x274   :  { %v532_v17 = vpack.c.bf16 %v514_v15, %v511_v14 }
 0x275   :  { %523 = vmatpush.bf16.msrb.mxu2 %v515_v16 }
 0x276   :  { %540 = vmatpush.bf16.msrb.mxu3 %v532_v17  ;;  %v478_v45 = vpop.f32.mrf.mxu3 }
 0x277   :  { %v512_v23 = vadd.f32 %v478_v45, %v1011_v41  ;;  %v560_v41 = vsub.f32 1.0, %v1041_v43 }
 0x278   :  { %736 = vmatmul.msk.bf16.vlgmr.msrb.gmra.mxu2 %vm324_vm3, %v1020_v53 }
 0x279   :  { %737 = vmatmul.msk.bf16.vlgmr.msrb.gmra.mxu3 %vm324_vm3, %v1027_v59  ;;  %v777_v59 = vld [vmem:[%s1099_s8] ss:$0 sm:$0xff] }
 0x2fb   :  { %v525_v19 = vpop.f32.mrf.mxu2 }
 0x2fc   :  { %v530_v20 = vadd.f32 %v525_v19, %v509_v62  ;;  %v542_v53 = vpop.f32.mrf.mxu3 }
 0x2fe   :  { %v547_v21 = vadd.f32 %v542_v53, %v530_v20 }
 0x300   :  { %v553_v22 = vadd.f32 %v777_v59, %v547_v21 }
 0x302   :  { %787 = vtanh.f32 %v553_v22 }
 0x303   :  { %v527_v24 = vpop.f32.mrf.mxu2 }
 0x304   :  { %v531_v25 = vadd.f32 %v527_v24, %v512_v23  ;;  %v544_v26 = vpop.f32.mrf.mxu3 }
 0x306   :  { %v548_v27 = vadd.f32 %v544_v26, %v531_v25 }
 0x308   :  { %v788_v29 = vpop.eup %787  ;;  %v554_v39 = vadd.f32 %v777_v59, %v548_v27 }
 0x309   :  { %v561_v32 = vmul.f32 %v788_v29, %v559_v28 }
 0x30a   :  { %789 = vtanh.f32 %v554_v39 }
 0x30b   :  { %v563_v35 = vadd.f32 %v561_v32, %v557_v31 }
 0x30d   :  { %565 = vst.msk [vmem:[#allocation2] sm:$0xff] %vm93_vm0, %v563_v35  ;;  %v569_v44 = vmax.f32 %v563_v35, 0.0 }
 0x30e   :  { %567 = vst.msk [vmem:[#allocation10] sm:$0xff] %vm93_vm0, %v563_v35 }
 0x310   :  { %v790_v36 = vpop.eup %789 }
 0x311   :  { %v562_v38 = vmul.f32 %v790_v36, %v560_v41 }
 0x313   :  { %v564_v40 = vadd.f32 %v562_v38, %v558_v37 }
 0x315   :  { %566 = vst.msk [vmem:[#allocation2 + $0x8] sm:$0xff] %vm93_vm0, %v564_v40  ;;  %v570_v46 = vmax.f32 %v564_v40, 0.0 }
 0x316   :  { %568 = vst.msk [vmem:[#allocation10 + $0x8] sm:$0xff] %vm93_vm0, %v564_v40 }
 0x317   :  { %v571_v33 = vpack.c.bf16 %v570_v46, %v569_v44  ;;  %650 = dma.vmem_to_hbm [thread:$0]  %s643_s14, 256, %s645_s17, [#allocation6], %s901_s5, %s901_s5, %s902_s18  }
 0x319   :  { %746 = vmatmul.msk.bf16.vlgmr.msra.gmra.mxu0 %vm93_vm0, %v571_v33 }
 0x396   :  { %v604_v34 = vpop.f32.mrf.mxu0 }
 0x397   :  { %v605_v43 = vadd.f32 %v778_v47, %v604_v34 }
 0x399   :  { %617 = vperm.xlu1 %774, %v605_v43  }
 0x39e   :  { %v606_v48 = vpop.f32.mrf.mxu0 }
 0x39f   :  { %v607_v49 = vadd.f32 %v778_v47, %v606_v48 }
 0x3a1   :  { %622 = vperm.xlu1 %774, %v607_v49  }
 0x40b   :  { %v618_v52 = vpop.permute.xlu1 %617 }
 0x40c   :  { %v625_v54 = vsel %vm612_vm12, %v618_v52, 0.0 }
 0x40d   :  { %634 = vst [vmem:[%s1102_s11] sm:$0xff] %v625_v54 }
 0x413   :  { %v623_v55 = vpop.permute.xlu1 %622 }
 0x414   :  { %v626_v56 = vsel %vm612_vm12, %v623_v55, 0.0 }
 0x415   :  { %635 = vst [vmem:[%s1102_s11 + $0x8] sm:$0xff] %v626_v56 }
 0x416   :  { %891 = dma.done.wait [#allocation6], 256  }
 0x417   :  { %892 = vsyncadd [#allocation6], 4294967040 }
 0x418   :  { %657 = vsyncpa [#allocation5], 1 }
 0x419   :  { %658 = vsyncpa [#allocation8], 1 }
 0x41a   :  { %659 = vsyncpa [#allocation6], 1 }

</bundles_post_ra>
